<compile_context>
chip_gen: v5e
topology: v5e:2x2
jax: 0.10.0
libtpu: 0.0.40
codegen_flags: <defaults>
</compile_context>

<pallas_src>
import math
from functools import partial

import jax
import jax.numpy as jnp
from jax.experimental import pallas as pl
from jax.experimental.pallas import tpu as pltpu


def _num_tensorcores():
    """Best-effort TensorCore count (v7x has 2/chip); defensive against attr drift."""
    try:
        info = pltpu.get_tpu_info()
        for attr in ("num_cores", "core_count", "num_tensorcores", "tensorcores_per_chip"):
            v = getattr(info, attr, None)
            if isinstance(v, int) and 1 <= v <= 16:
                return v
    except Exception:
        pass
    return 1


def _pick_batch_block(n, cin, num_cores=1, cap=8):
    """Images per grid step.

    Prefer NB with NB*cin % 8 == 0 (full-sublane tiles -> unmasked loads/stores), then a grid
    deep enough that every TensorCore gets >= 2 pipelined steps, then the largest such NB
    (amortize the ~0.35us/step overhead).
    """
    aligned = [nb for nb in range(1, min(n, cap) + 1)
               if n % nb == 0 and (nb * cin) % 8 == 0]
    if not aligned:
        # TODO(synk): for unaligned Cin at large N, pad channels instead of using one big block.
        return n  # single full-array block is always a legal BlockSpec
    target = max(2, 2 * num_cores)

    def key(nb):
        grid = n // nb
        return (grid >= target, grid >= 2, nb)

    return max(aligned, key=key)


def _conv3x3_block_kernel(x_ref, w_ref, b_ref, m_ref, o_ref, patches_ref, *, H, W, CB):
    """One grid step = NB images, fully fused.

    x_ref:       (CB, HW)      CB = NB*Cin rows (image-major, channel-minor), flat spatial lanes
    w_ref:       (MB, KP)      block-diagonal weights, MB = NB*Cout, KP = 9*CB
    b_ref:       (MB, 1)       per-row bias (bias tiled per image)
    m_ref:       (9, HW)       halo masks per tap (precomputed host-side, constant)
    o_ref:       (MB, HW)      outputs (lane-dense, sublane-dense)
    patches_ref: (KP, HW)      VMEM scratch: im2col patch matrix for the whole block
    """
    HW = H * W
    x = x_ref[...]                                   # (CB, HW), loaded once
    for kh in range(3):
        for kw in range(3):
            dh, dw = kh - 1, kw - 1
            t = kh * 3 + kw
            shift = (-(dh * W + dw)) % HW
            # One XLU lane-rotation covers every image/channel row of the block.
            rolled = pltpu.roll(x, shift=shift, axis=1) if shift else x
            if dh == 0 and dw == 0:
                patches_ref[t * CB:(t + 1) * CB, :] = rolled          # centre tap: no mask
            else:
                # Boundary zeroing via one broadcast multiply (VPU); full-tile store when CB%8==0.
                patches_ref[t * CB:(t + 1) * CB, :] = rolled * m_ref[t:t + 1, :]
    # Single MXU contraction for all taps, channels and images in the block.
    out = jnp.dot(w_ref[...], patches_ref[...], preferred_element_type=jnp.float32)
    o_ref[...] = (out + b_ref[...].astype(jnp.float32)).astype(o_ref.dtype)


def _conv2d_3x3_same_flat(x_flat, w_big, b_big, masks, *, H, W, NB, Cin, Cout):
    """x_flat: (N*Cin, HW); w_big: (NB*Cout, 9*NB*Cin); b_big: (NB*Cout, 1); masks: (9, HW)."""
    NC, HW = x_flat.shape
    N = NC // Cin
    CB = NB * Cin
    MB = NB * Cout
    KP = 9 * CB
    grid = N // NB
    kernel = partial(_conv3x3_block_kernel, H=H, W=W, CB=CB)
    return pl.pallas_call(
        kernel,
        out_shape=jax.ShapeDtypeStruct((N * Cout, HW), x_flat.dtype),
        grid_spec=pltpu.PrefetchScalarGridSpec(
            num_scalar_prefetch=0,
            grid=(grid,),
            in_specs=[
                pl.BlockSpec((CB, HW), lambda i: (i, 0)),
                pl.BlockSpec((MB, KP), lambda i: (0, 0)),   # constant: fetched once
                pl.BlockSpec((MB, 1), lambda i: (0, 0)),    # constant: fetched once
                pl.BlockSpec((9, HW), lambda i: (0, 0)),    # constant: fetched once
            ],
            out_specs=pl.BlockSpec((MB, HW), lambda i: (i, 0)),
            scratch_shapes=[pltpu.VMEM((KP, HW), x_flat.dtype)],
        ),
        compiler_params=pltpu.CompilerParams(
            dimension_semantics=("parallel",)),
    )(x_flat, w_big, b_big, masks)


def einops_wrapper_forward(x_btchw, weight_oihw, bias):
    """EinopsWrapper.forward:
       rearrange 'b t c h w -> (b t) c h w', Conv2d(C, C, 3, padding=1), rearrange back."""
    B, T, C, H, W = x_btchw.shape
    Cout, Cin, KH, KW = weight_oihw.shape
    assert (KH, KW) == (3, 3) and Cin == C
    N = B * T
    HW = H * W

    NB = _pick_batch_block(N, Cin, num_cores=_num_tensorcores())
    CB = NB * Cin
    MB = NB * Cout
    KP = 9 * CB

    # 'b t c h w -> ((b t) c) (h w)': contiguous, metadata-only reshape (no HBM traffic).
    x_flat = x_btchw.reshape(N * Cin, HW)

    # Block-diagonal weight: W_big[n*Cout+o, t*CB + m*Cin + c] = W[o, c, kh, kw] iff n == m.
    w_tap = jnp.transpose(weight_oihw, (2, 3, 0, 1)).reshape(9, Cout, Cin)   # (tap, o, c)
    eye = jnp.eye(NB, dtype=w_tap.dtype)
    w_big = jnp.einsum('nm,toc->notmc', eye, w_tap).reshape(MB, KP)
    b_big = jnp.tile(bias, NB).reshape(MB, 1)

    # Halo masks per tap, precomputed once host-side (kept in x's dtype for a cheap VPU mul).
    hh = jnp.arange(HW, dtype=jnp.int32) // W
    ww = jnp.arange(HW, dtype=jnp.int32) % W
    rows = []
    for kh in range(3):
        for kw in range(3):
            dh, dw = kh - 1, kw - 1
            m = (hh + dh >= 0) & (hh + dh < H) & (ww + dw >= 0) & (ww + dw < W)
            rows.append(m.astype(x_btchw.dtype))
    masks = jnp.stack(rows)                                                   # (9, HW)

    y_flat = _conv2d_3x3_same_flat(x_flat, w_big, b_big, masks,
                                   H=H, W=W, NB=NB, Cin=Cin, Cout=Cout)
    # '((b t) c) (h w) -> b t c h w': metadata-only reshape.
    return y_flat.reshape(B, T, Cout, H, W)


if __name__ == "__main__":
    B, T, C, H, W = 2, 3, 4, 16, 16
    key = jax.random.PRNGKey(0)
    kx, kw, kb = jax.random.split(key, 3)

    x = jax.random.normal(kx, (B, T, C, H, W), jnp.float32)

    # Deterministic Conv2d(C, C, 3, padding=1) default init (kaiming_uniform a=sqrt(5)):
    fan_in = C * 3 * 3
    bound = 1.0 / math.sqrt(fan_in)
    weight = jax.random.uniform(kw, (C, C, 3, 3), jnp.float32, -bound, bound)  # OIHW
    bias = jax.random.uniform(kb, (C,), jnp.float32, -bound, bound)

    y = einops_wrapper_forward(x, weight, bias)
    y = jax.block_until_ready(y)

    # Reference check against XLA conv.
    ref = jax.lax.conv_general_dilated(
        x.reshape(B * T, C, H, W), weight, window_strides=(1, 1), padding="SAME",
        dimension_numbers=("NCHW", "OIHW", "NCHW"))
    ref = (ref + bias[None, :, None, None]).reshape(B, T, C, H, W)

    assert y.shape == x.shape and y.dtype == x.dtype
    assert jnp.allclose(y, ref, atol=2e-3, rtol=2e-3), float(jnp.max(jnp.abs(y - ref)))
    print("KERNEL_OK")
</pallas_src>

<mosaic_0001>
module attributes {stable_mosaic.version = 11 : i64} {
  func.func @_conv3x3_block_kernel(%arg0: i32, %arg1: memref<8x256xf32, #tpu.memory_space<vmem>>, %arg2: memref<8x72xf32, #tpu.memory_space<vmem>>, %arg3: memref<8x1xf32, #tpu.memory_space<vmem>>, %arg4: memref<9x256xf32, #tpu.memory_space<vmem>>, %arg5: memref<8x256xf32, #tpu.memory_space<vmem>>, %arg6: memref<72x256xf32, #tpu.memory_space<vmem>>) attributes {dimension_semantics = [#tpu.dimension_semantics<parallel>], iteration_bounds = array<i64: 3>, scalar_prefetch = 0 : i64, scratch_operands = 1 : i64, tpu.core_type = #tpu.core_type<tc>, window_params = [{transform_indices = @transform_0, window_bounds = array<i64: 8, 256>}, {pipeline_mode = #tpu.pipeline_mode<synchronous>, transform_indices = @transform_1, window_bounds = array<i64: 8, 72>}, {pipeline_mode = #tpu.pipeline_mode<synchronous>, transform_indices = @transform_2, window_bounds = array<i64: 8, 1>}, {pipeline_mode = #tpu.pipeline_mode<synchronous>, transform_indices = @transform_3, window_bounds = array<i64: 9, 256>}, {transform_indices = @transform_4, window_bounds = array<i64: 8, 256>}]} {
    %c0 = arith.constant 0 : index
    %c0_0 = arith.constant 0 : index
    %0 = vector.load %arg1[%c0, %c0_0] : memref<8x256xf32, #tpu.memory_space<vmem>>, vector<8x256xf32>
    %c17_i32 = arith.constant 17 : i32
    %1 = tpu.dynamic_rotate %0 by %c17_i32 dim 1 : vector<8x256xf32>, i32 -> vector<8x256xf32>
    %c0_1 = arith.constant 0 : index
    %c0_2 = arith.constant 0 : index
    %2 = vector.load %arg4[%c0_1, %c0_2] : memref<9x256xf32, #tpu.memory_space<vmem>>, vector<1x256xf32>
    %3 = vector.broadcast %2 : vector<1x256xf32> to vector<8x256xf32>
    %4 = arith.mulf %1, %3 : vector<8x256xf32>
    %c0_3 = arith.constant 0 : index
    %c0_4 = arith.constant 0 : index
    %5 = vector.load %arg6[%c0_3, %c0_4] : memref<72x256xf32, #tpu.memory_space<vmem>>, vector<8x256xf32>
    tpu.vector_store %arg6[%c0_3, %c0_4], %4 {strides = array<i32>} : memref<72x256xf32, #tpu.memory_space<vmem>>, vector<8x256xf32>,
    %c16_i32 = arith.constant 16 : i32
    %6 = tpu.dynamic_rotate %0 by %c16_i32 dim 1 : vector<8x256xf32>, i32 -> vector<8x256xf32>
    %c1 = arith.constant 1 : index
    %c0_5 = arith.constant 0 : index
    %7 = vector.load %arg4[%c1, %c0_5] : memref<9x256xf32, #tpu.memory_space<vmem>>, vector<1x256xf32>
    %8 = vector.broadcast %7 : vector<1x256xf32> to vector<8x256xf32>
    %9 = arith.mulf %6, %8 : vector<8x256xf32>
    %c8 = arith.constant 8 : index
    %c0_6 = arith.constant 0 : index
    %10 = vector.load %arg6[%c8, %c0_6] : memref<72x256xf32, #tpu.memory_space<vmem>>, vector<8x256xf32>
    tpu.vector_store %arg6[%c8, %c0_6], %9 {strides = array<i32>} : memref<72x256xf32, #tpu.memory_space<vmem>>, vector<8x256xf32>,
    %c15_i32 = arith.constant 15 : i32
    %11 = tpu.dynamic_rotate %0 by %c15_i32 dim 1 : vector<8x256xf32>, i32 -> vector<8x256xf32>
    %c2 = arith.constant 2 : index
    %c0_7 = arith.constant 0 : index
    %12 = vector.load %arg4[%c2, %c0_7] : memref<9x256xf32, #tpu.memory_space<vmem>>, vector<1x256xf32>
    %13 = vector.broadcast %12 : vector<1x256xf32> to vector<8x256xf32>
    %14 = arith.mulf %11, %13 : vector<8x256xf32>
    %c16 = arith.constant 16 : index
    %c0_8 = arith.constant 0 : index
    %15 = vector.load %arg6[%c16, %c0_8] : memref<72x256xf32, #tpu.memory_space<vmem>>, vector<8x256xf32>
    tpu.vector_store %arg6[%c16, %c0_8], %14 {strides = array<i32>} : memref<72x256xf32, #tpu.memory_space<vmem>>, vector<8x256xf32>,
    %c1_i32 = arith.constant 1 : i32
    %16 = tpu.dynamic_rotate %0 by %c1_i32 dim 1 : vector<8x256xf32>, i32 -> vector<8x256xf32>
    %c3 = arith.constant 3 : index
    %c0_9 = arith.constant 0 : index
    %17 = vector.load %arg4[%c3, %c0_9] : memref<9x256xf32, #tpu.memory_space<vmem>>, vector<1x256xf32>
    %18 = vector.broadcast %17 : vector<1x256xf32> to vector<8x256xf32>
    %19 = arith.mulf %16, %18 : vector<8x256xf32>
    %c24 = arith.constant 24 : index
    %c0_10 = arith.constant 0 : index
    %20 = vector.load %arg6[%c24, %c0_10] : memref<72x256xf32, #tpu.memory_space<vmem>>, vector<8x256xf32>
    tpu.vector_store %arg6[%c24, %c0_10], %19 {strides = array<i32>} : memref<72x256xf32, #tpu.memory_space<vmem>>, vector<8x256xf32>,
    %c32 = arith.constant 32 : index
    %c0_11 = arith.constant 0 : index
    %21 = vector.load %arg6[%c32, %c0_11] : memref<72x256xf32, #tpu.memory_space<vmem>>, vector<8x256xf32>
    tpu.vector_store %arg6[%c32, %c0_11], %0 {strides = array<i32>} : memref<72x256xf32, #tpu.memory_space<vmem>>, vector<8x256xf32>,
    %c255_i32 = arith.constant 255 : i32
    %22 = tpu.dynamic_rotate %0 by %c255_i32 dim 1 : vector<8x256xf32>, i32 -> vector<8x256xf32>
    %c5 = arith.constant 5 : index
    %c0_12 = arith.constant 0 : index
    %23 = vector.load %arg4[%c5, %c0_12] : memref<9x256xf32, #tpu.memory_space<vmem>>, vector<1x256xf32>
    %24 = vector.broadcast %23 : vector<1x256xf32> to vector<8x256xf32>
    %25 = arith.mulf %22, %24 : vector<8x256xf32>
    %c40 = arith.constant 40 : index
    %c0_13 = arith.constant 0 : index
    %26 = vector.load %arg6[%c40, %c0_13] : memref<72x256xf32, #tpu.memory_space<vmem>>, vector<8x256xf32>
    tpu.vector_store %arg6[%c40, %c0_13], %25 {strides = array<i32>} : memref<72x256xf32, #tpu.memory_space<vmem>>, vector<8x256xf32>,
    %c241_i32 = arith.constant 241 : i32
    %27 = tpu.dynamic_rotate %0 by %c241_i32 dim 1 : vector<8x256xf32>, i32 -> vector<8x256xf32>
    %c6 = arith.constant 6 : index
    %c0_14 = arith.constant 0 : index
    %28 = vector.load %arg4[%c6, %c0_14] : memref<9x256xf32, #tpu.memory_space<vmem>>, vector<1x256xf32>
    %29 = vector.broadcast %28 : vector<1x256xf32> to vector<8x256xf32>
    %30 = arith.mulf %27, %29 : vector<8x256xf32>
    %c48 = arith.constant 48 : index
    %c0_15 = arith.constant 0 : index
    %31 = vector.load %arg6[%c48, %c0_15] : memref<72x256xf32, #tpu.memory_space<vmem>>, vector<8x256xf32>
    tpu.vector_store %arg6[%c48, %c0_15], %30 {strides = array<i32>} : memref<72x256xf32, #tpu.memory_space<vmem>>, vector<8x256xf32>,
    %c240_i32 = arith.constant 240 : i32
    %32 = tpu.dynamic_rotate %0 by %c240_i32 dim 1 : vector<8x256xf32>, i32 -> vector<8x256xf32>
    %c7 = arith.constant 7 : index
    %c0_16 = arith.constant 0 : index
    %33 = vector.load %arg4[%c7, %c0_16] : memref<9x256xf32, #tpu.memory_space<vmem>>, vector<1x256xf32>
    %34 = vector.broadcast %33 : vector<1x256xf32> to vector<8x256xf32>
    %35 = arith.mulf %32, %34 : vector<8x256xf32>
    %c56 = arith.constant 56 : index
    %c0_17 = arith.constant 0 : index
    %36 = vector.load %arg6[%c56, %c0_17] : memref<72x256xf32, #tpu.memory_space<vmem>>, vector<8x256xf32>
    tpu.vector_store %arg6[%c56, %c0_17], %35 {strides = array<i32>} : memref<72x256xf32, #tpu.memory_space<vmem>>, vector<8x256xf32>,
    %c239_i32 = arith.constant 239 : i32
    %37 = tpu.dynamic_rotate %0 by %c239_i32 dim 1 : vector<8x256xf32>, i32 -> vector<8x256xf32>
    %c8_18 = arith.constant 8 : index
    %c0_19 = arith.constant 0 : index
    %38 = vector.load %arg4[%c8_18, %c0_19] : memref<9x256xf32, #tpu.memory_space<vmem>>, vector<1x256xf32>
    %39 = vector.broadcast %38 : vector<1x256xf32> to vector<8x256xf32>
    %40 = arith.mulf %37, %39 : vector<8x256xf32>
    %c64 = arith.constant 64 : index
    %c0_20 = arith.constant 0 : index
    %41 = vector.load %arg6[%c64, %c0_20] : memref<72x256xf32, #tpu.memory_space<vmem>>, vector<8x256xf32>
    tpu.vector_store %arg6[%c64, %c0_20], %40 {strides = array<i32>} : memref<72x256xf32, #tpu.memory_space<vmem>>, vector<8x256xf32>,
    %c0_21 = arith.constant 0 : index
    %c0_22 = arith.constant 0 : index
    %42 = vector.load %arg2[%c0_21, %c0_22] : memref<8x72xf32, #tpu.memory_space<vmem>>, vector<8x72xf32>
    %c0_23 = arith.constant 0 : index
    %c0_24 = arith.constant 0 : index
    %43 = vector.load %arg6[%c0_23, %c0_24] : memref<72x256xf32, #tpu.memory_space<vmem>>, vector<72x256xf32>
    %cst = arith.constant dense<0.000000e+00> : vector<8x256xf32>
    %44 = tpu.matmul %42, %43, %cst {dimension_numbers = #tpu.dot_dimension_numbers<[1], [0], [0], [1], [0, 0, 1, 1], [], []>} : vector<8x72xf32>, vector<72x256xf32>, vector<8x256xf32> -> vector<8x256xf32>
    %c0_25 = arith.constant 0 : index
    %c0_26 = arith.constant 0 : index
    %45 = vector.load %arg3[%c0_25, %c0_26] : memref<8x1xf32, #tpu.memory_space<vmem>>, vector<8x1xf32>
    %46 = vector.broadcast %45 : vector<8x1xf32> to vector<8x256xf32>
    %47 = arith.addf %44, %46 : vector<8x256xf32>
    %c0_27 = arith.constant 0 : index
    %c0_28 = arith.constant 0 : index
    %48 = vector.load %arg5[%c0_27, %c0_28] : memref<8x256xf32, #tpu.memory_space<vmem>>, vector<8x256xf32>
    tpu.vector_store %arg5[%c0_27, %c0_28], %47 {strides = array<i32>} : memref<8x256xf32, #tpu.memory_space<vmem>>, vector<8x256xf32>,
    return
  }
  func.func @transform_0(%arg0: i32) -> (i32, i32) {
    %c0_i32 = arith.constant 0 : i32
    %c0_i32_0 = arith.constant 0 : i32
    return %arg0, %c0_i32 : i32, i32
  }
  func.func @transform_1(%arg0: i32) -> (i32, i32) {
    %c0_i32 = arith.constant 0 : i32
    %c0_i32_0 = arith.constant 0 : i32
    %c0_i32_1 = arith.constant 0 : i32
    return %c0_i32, %c0_i32_0 : i32, i32
  }
  func.func @transform_2(%arg0: i32) -> (i32, i32) {
    %c0_i32 = arith.constant 0 : i32
    %c0_i32_0 = arith.constant 0 : i32
    %c0_i32_1 = arith.constant 0 : i32
    return %c0_i32, %c0_i32_0 : i32, i32
  }
  func.func @transform_3(%arg0: i32) -> (i32, i32) {
    %c0_i32 = arith.constant 0 : i32
    %c0_i32_0 = arith.constant 0 : i32
    %c0_i32_1 = arith.constant 0 : i32
    return %c0_i32, %c0_i32_0 : i32, i32
  }
  func.func @transform_4(%arg0: i32) -> (i32, i32) {
    %c0_i32 = arith.constant 0 : i32
    %c0_i32_0 = arith.constant 0 : i32
    return %arg0, %c0_i32 : i32, i32
  }
}

</mosaic_0001>

<bundles_post_ra>
// kernel: tpu_custom_call.1
= control target key start
LH: loop header
LB: loop body
LE: loop exit
PB: predicated region body
PF: predicated region fallthrough
CT: control target
= control target key end

     0   :  { %9 = vsyncpa [#allocation4], 0  ;;  %s989_s0 = inlined_call_operand.hbm [shape: f32[24,256], index: 0, kind: input, shape index: {}]   ;;  %s990_s1 = inlined_call_operand.vmem [shape: f32[8,72], index: 1, kind: input, shape index: {}]   ;;  %s991_s2 = inlined_call_operand.vmem [shape: f32[8,1], index: 2, kind: input, shape index: {}]   ;;  %s992_s3 = inlined_call_operand.hbm [shape: f32[9,256], index: 3, kind: input, shape index: {}]   ;;  %s993_s4 = inlined_call_operand.hbm [shape: f32[24,256], index: 4, kind: output, shape index: {}]  }
   0x1   :  { %11 = vsyncpa [#allocation4 + $0x1], 0 }
   0x2   :  { %12 = vsyncpa [#allocation7], 0 }
   0x3   :  { %13 = vsyncpa [#allocation5], 0 }
   0x4   :  { %15 = vsyncpa [#allocation5 + $0x1], 0  ;;  %s809_s15 = smov 0   ;;  %s811_s16 = smov 0  }
   0x5   :  { %s813_s17 = smov 0   ;;  %s815_s18 = smov 0  }
   0x6 LB: > { %s158_s21 = sshll.u32 %s992_s3, 4  ;;  %s833_s22 = sadd.s32 4294967295, %s770_s18   ;;  %s770_s18 = sphi %s815_s18, %s1002_s18   ;;  %s766_s17 = sphi %s813_s17, %s1001_s17   ;;  %s762_s16 = sphi %s811_s16, %s1000_s16   ;;  %s758_s15 = sphi %s809_s15, %s999_s15   ;;  %s159_s21 = int_to_ptr.hbm [resolvable:$true] %s158_s21 }
   0x7   : > { %p551_p0 = scmp.ge.s32.totalorder %s770_s18, 1  ;;  %p42_p1 = scmp.eq.s32.totalorder %s833_s22, 0 }
   0x8   : > { %p141_p2 = scmp.lt.s32.totalorder %s770_s18, 4  ;;  %s772_s24 = smov [#allocation6]  }
   0x9   : > { %s160_s25 = sshll.u32 %s772_s24, 4  ;;  %s773_s26 = smov 256   ;;  %s161_s25 = int_to_ptr.vmem [resolvable:$true] %s160_s25 }
   0xa   : > { %p838_p3 = pnand %p551_p0, %p141_p2  ;;  %s774_s27 = smov 16  }
   0xb   : > { %s550_s28 = sadd.s32 4294967294, %s770_s18   ;;  %s848_s29 = sadd.s32 1, %s770_s18  }
   0xc   : > { %p578_p4 = pneg %p838_p3  ;;  %s28_s30 = sadd.s32 1, %s766_s17 }
   0xd   : > { %s25_s5 = ssub.s32 %s770_s18, %s848_s29  ;;  %p35_p6 = scmp.ne.s32.totalorder %s766_s17, %s762_s16 }
   0xe   : > { %p579_p5 = pnand %p578_p4, %p42_p1  ;;  %p26_p7 = scmp.eq.s32.totalorder %s25_s5, 0 }
   0xf   : > { %p36_p8 = scmp.eq.s32.totalorder %s770_s18, 0  ;;  %p41_p9 = scmp.ne.s32.totalorder %s762_s16, %s758_s15 }
  0x10   : > { %581 = dma.hbm_to_vmem [thread:$0]  (!%p579_p5), %s159_s21, 512, %s161_s25, [#allocation7], %s773_s26, %s773_s26, %s774_s27  }
  0x11   : > { %p128_p10 = scmp.eq.s32.totalorder %s833_s22, 2  ;;  %p864_p11 = por %p42_p1, %p41_p9 }
  0x12   : > { %s860_s6 = scalar_select %p26_p7, %s766_s17, %s28_s30  }
  0x13   : > { %p868_p12 = por %p128_p10, %p35_p6  ;;  %p134_p13 = scmp.eq.s32.totalorder %s550_s28, 2 }
  0x14   : > { %p37_p0 = por %p36_p8, %p35_p6  ;;  %s174_s9 = sand.u32 1, %s766_s17  }
  0x15   : > { %p873_p2 = por %p134_p13, %p41_p9  ;;  %p591_p4 = scmp.lt.s32.totalorder %s770_s18, 3 }
  0x16   : > { %s554_s11 = sshll.u32 %s174_s9, 4  ;;  %s568_s12 = sshll.u32 %s770_s18, 4 }
  0x17   : > { %s183_s19 = scalar_lea.hbm %s989_s0, %s568_s12  ;;  %s178_s21 = scalar_lea.vmem [#allocation3], %s554_s11 }
  0x18   : > { %s185_s20 = sshll.u32 %s183_s19, 4  ;;  %s187_s24 = sshll.u32 %s178_s21, 4  ;;  %s186_s20 = int_to_ptr.hbm [resolvable:$true] %s185_s20  ;;  %s188_s24 = int_to_ptr.vmem [resolvable:$true] %s187_s24 }
  0x19   : > { %p882_p5 = pnand %p591_p4, %p37_p0  ;;  %s175_s26 = scalar_lea.sflag [#allocation4], %s174_s9 }
  0x1a   : > { %s670_s27 = sshra.s32 %s186_s20, 4  ;;  %s677_s11 = scalar_lea.hbm %s989_s0, 48  ;;  %s671_s27 = int_to_ptr.hbm [resolvable:$true] %s670_s27 }
  0x1b   : > { %s672_s28 = scalar_lea.hbm %s671_s27, 16  ;;  %p674_p7 = pneg %p882_p5 }
  0x1c   : > { %p673_p6 = scmp.ne.s32.totalorder %s671_s27, %s672_s28  ;;  %p678_p10 = scmp.lt.s32.totalorder %s671_s27, %s989_s0 }
  0x1d   : > { %p679_p13 = scmp.lt.s32.totalorder %s677_s11, %s672_s28 }
  0x1e   : > { %p675_p8 = pnand %p674_p7, %p673_p6 }
  0x1f   : > { %p680_p0 = por %p679_p13, %p678_p10 }
  0x20   : > { %p676_p9 = pneg %p675_p8 }
  0x22   : > { %p681_p4 = pnand %p680_p0, %p676_p9 }
  0x24   : > { %684 = shalt.err (!%p681_p4)
}
  0x25   : > { %585 = dma.hbm_to_vmem [thread:$0]  (!%p882_p5), %s186_s20, 256, %s188_s24, %s175_s26  }
  0x26   : > { %196 = sbr.rel (%p838_p3) target bundleno = 338 (0x152), region = 36  ;;  %s899_s9 = sand.u32 (!%p838_p3), 1, %s762_s16  }
  0x27   : > { %s558_s14 = sshll.u32 (!%p838_p3), %s899_s9, 4  ;;  %s199_s19 = scalar_lea.sflag (!%p838_p3), [#allocation4], %s899_s9 }
  0x28   : > { %s202_s21 = scalar_lea.vmem (!%p838_p3), [#allocation3], %s558_s14 }
  0x2b   : > { %745 = dma.done.wait (%p864_p11), %s199_s19, 256  }
  0x2c   : > { %747 = vsyncadd (%p864_p11), %s199_s19, 4294967040 }
  0x2d   : > { %749 = dma.done.wait (%p42_p1), [#allocation7], 512  }
  0x2e   : > { %751 = vsyncadd (%p42_p1), [#allocation7], 4294966784  ;;  %v913_v0 = vld [vmem:[%s202_s21] sm:$0xff]  ;;  %s775_s23 = smov 112   ;;  %s776_s20 = smov 111   ;;  %v918_v1 = vld [vmem:[%s202_s21 + $0x8] sm:$0xff]  ;;  %v239_v3 = vlaneseq }
  0x2f   : > { %346 = vrot.lane.b32.xlu1 %v913_v0, %s775_s23  ;;  %364 = vrot.lane.b32.xlu0 %v913_v0, %s776_s20  ;;  %s777_s24 = smov 113   ;;  %s778_s7 = smov 127   ;;  %v372_v7 = vld [vmem:[#allocation6 + $0x10] ss:$8 sm:$0x3]  ;;  %v401_v35 = vld [vmem:[%s991_s2] sm:$0xff] }
  0x30   : > { %328 = vrot.lane.b32.xlu2 %v913_v0, %s777_s24  ;;  %s779_s25 = smov 1   ;;  %s780_s26 = smov 15   ;;  %v933_v6 = vand.u32 127, %v239_v3  ;;  %v354_v9 = vld [vmem:[#allocation6 + $0x7] ss:$8 sm:$0x3] }
  0x31   : > { %s781_s27 = smov 16   ;;  %s782_s28 = smov 17   ;;  %v374_v10 = vperm.slane %v372_v7, 0  ;;  %v375_v11 = vperm.slane %v372_v7, 1  ;;  %v356_v15 = vperm.slane %v354_v9, 0  ;;  %v357_v16 = vperm.slane %v354_v9, 1 }
  0x32   : > { %vm350_vm0 = vcmp.lt.s32.totalorder %v933_v6, 112  ;;  %vm368_vm1 = vcmp.lt.s32.totalorder %v933_v6, 111  ;;  %v336_v12 = vld [vmem:[#allocation6 + $0x6] ss:$8 sm:$0x3]  ;;  %vm332_vm2 = vcmp.lt.s32.totalorder %v933_v6, 113 }
  0x33   : > { %v338_v23 = vperm.slane %v336_v12, 0  ;;  %v339_v24 = vperm.slane %v336_v12, 1  ;;  %v318_v27 = vld [vmem:[#allocation6 + $0x5] ss:$8 sm:$0x3]  ;;  %vm314_vm3 = vcmp.lt.s32.totalorder %v933_v6, 127 }
  0x34   : > { %v320_v33 = vperm.slane %v318_v27, 0  ;;  %v321_v34 = vperm.slane %v318_v27, 1  ;;  %v783_v36 = vmov 0   ;;  %v298_v43 = vld [vmem:[#allocation6 + $0x3] ss:$8 sm:$0x3] }
  0x35   : > { %638 = vset.pattern.permute.xlu1 %v783_v36  ;;  %639 = vset.pattern.permute.xlu0 %v783_v36  ;;  %v280_v44 = vld [vmem:[#allocation6 + $0x2] ss:$8 sm:$0x3]  ;;  %vm294_vm4 = vcmp.lt.s32.totalorder %v933_v6, 1  ;;  %v300_v45 = vperm.slane %v298_v43, 0  ;;  %v301_v46 = vperm.slane %v298_v43, 1 }
  0x36   : > { %vm276_vm5 = vcmp.lt.s32.totalorder %v933_v6, 15  ;;  %v282_v48 = vperm.slane %v280_v44, 0  ;;  %v283_v49 = vperm.slane %v280_v44, 1  ;;  %v262_v60 = vld [vmem:[#allocation6 + $0x1] ss:$8 sm:$0x3] }
  0x37   : > { %348 = vrot.lane.b32.xlu1 %v918_v1, %s775_s23  ;;  %366 = vrot.lane.b32.xlu0 %v918_v1, %s776_s20  ;;  %vm258_vm6 = vcmp.lt.s32.totalorder %v933_v6, 16  ;;  %v264_v61 = vperm.slane %v262_v60, 0  ;;  %v265_v62 = vperm.slane %v262_v60, 1  ;;  %vm241_vm7 = vcmp.lt.s32.totalorder %v933_v6, 17  ;;  %s569_s13 = sshll.u32 %s833_s22, 4  ;;  %s232_s20 = scalar_lea.vmem [#allocation8], %s558_s14 }
  0x38   : > { %330 = vrot.lane.b32.xlu2 %v918_v1, %s777_s24  ;;  %vm407_vm8 = vcmask 588800   ;;  %s465_s23 = scalar_lea.hbm %s993_s4, %s569_s13  ;;  %s467_s24 = sshll.u32 %s232_s20, 4  ;;  %s468_s24 = int_to_ptr.vmem [resolvable:$true] %s467_s24 }
  0x3f   : > { %312 = vrot.lane.b32.xlu1 %v918_v1, %s778_s7  ;;  %310 = vrot.lane.b32.xlu0 %v913_v0, %s778_s7  ;;  %s469_s7 = sshll.u32 %s465_s23, 4  ;;  %s470_s7 = int_to_ptr.hbm [resolvable:$true] %s469_s7 }
  0x40   : > { %290 = vrot.lane.b32.xlu2 %v913_v0, %s779_s25  ;;  %s714_s22 = sshra.s32 %s470_s7, 4  ;;  %s715_s22 = int_to_ptr.hbm [resolvable:$true] %s714_s22 }
  0x41   : > { %p721_p5 = scmp.lt.s32.totalorder %s715_s22, %s993_s4 }
  0x47   : > { %272 = vrot.lane.b32.xlu1 %v913_v0, %s780_s26  ;;  %292 = vrot.lane.b32.xlu0 %v918_v1, %s779_s25  ;;  %s454_s25 = scalar_lea.sflag [#allocation5], %s899_s9 }
  0x48   : > { %274 = vrot.lane.b32.xlu2 %v918_v1, %s780_s26  ;;  %s716_s26 = scalar_lea.hbm %s715_s22, 16 }
  0x49   : > { %p717_p1 = scmp.ne.s32.totalorder %s715_s22, %s716_s26 }
  0x4b   : > { %p718_p3 = pnand %p717_p1, %p868_p12 }
  0x4d   : > { %p719_p11 = pneg %p718_p3 }
  0x4f   : > { %256 = vrot.lane.b32.xlu1 %v918_v1, %s781_s27  ;;  %254 = vrot.lane.b32.xlu0 %v913_v0, %s781_s27 }
  0x50   : > { %235 = vrot.lane.b32.xlu2 %v913_v0, %s782_s28 }
  0x57   : > { %237 = vrot.lane.b32.xlu0 %v918_v1, %s782_s28  ;;  %404 = vperm.xlu1 %638, %v401_v35   ;;  %s720_s28 = scalar_lea.hbm %s993_s4, 48 }
  0x58   : > { %p722_p6 = scmp.lt.s32.totalorder %s720_s28, %s716_s26 }
  0x5a   : > { %p723_p7 = por %p722_p6, %p721_p5 }
  0x5c   : > { %p724_p8 = pnand %p723_p7, %p719_p11 }
  0x8a   : > { %v329_v2 = vpop.permute.xlu2 %328 }
  0x92   : > { %v331_v8 = vpop.permute.xlu2 %330 }
  0x93   : > { %v333_v25 = vsel %vm332_vm2, %v329_v2, %v331_v8  ;;  %v334_v26 = vsel %vm332_vm2, %v331_v8, %v329_v2 }
  0x94   : > { %v342_v31 = vmul.f32 %v338_v23, %v333_v25  ;;  %v343_v32 = vmul.f32 %v339_v24, %v334_v26 }
  0x9a   : > { %v291_v30 = vpop.permute.xlu2 %290 }
  0xa1   : > { %v347_v4 = vpop.permute.xlu1 %346  ;;  %v365_v5 = vpop.permute.xlu0 %364 }
  0xa2   : > { %v275_v47 = vpop.permute.xlu2 %274 }
  0xa9   : > { %v349_v13 = vpop.permute.xlu1 %348  ;;  %v367_v14 = vpop.permute.xlu0 %366 }
  0xaa   : > { %v351_v17 = vsel %vm350_vm0, %v347_v4, %v349_v13  ;;  %v352_v18 = vsel %vm350_vm0, %v349_v13, %v347_v4  ;;  %v369_v19 = vsel %vm368_vm1, %v365_v5, %v367_v14  ;;  %v370_v20 = vsel %vm368_vm1, %v367_v14, %v365_v5  ;;  %v244_v5 = vld [vmem:[#allocation6] ss:$8 sm:$0x3]  ;;  %v236_v7 = vpop.permute.xlu2 %235 }
  0xab   : > { %v378_v21 = vmul.f32 %v374_v10, %v369_v19  ;;  %v379_v22 = vmul.f32 %v375_v11, %v370_v20  ;;  %v360_v28 = vmul.f32 %v356_v15, %v351_v17  ;;  %v361_v29 = vmul.f32 %v357_v16, %v352_v18  ;;  %v382_v15 = vld [vmem:[%s990_s1] sm:$0xff] }
  0xac   : > { %v246_v8 = vperm.slane %v244_v5, 0  ;;  %v247_v9 = vperm.slane %v244_v5, 1 }
  0xad   : > { %418 = vmatpush.msra.mxu0 %v378_v21  ;;  %438 = vmatpush.msra.mxu1 %v379_v22 }
  0xaf   : > { %419 = vmatpush.msra.mxu0 %v360_v28  ;;  %439 = vmatpush.msra.mxu1 %v361_v29 }
  0xb1   : > { %v313_v37 = vpop.permute.xlu1 %312  ;;  %420 = vmatpush.msra.mxu0 %v342_v31  ;;  %440 = vmatpush.msra.mxu1 %v343_v32  ;;  %v311_v38 = vpop.permute.xlu0 %310 }
  0xb2   : > { %v315_v39 = vsel %vm314_vm3, %v311_v38, %v313_v37  ;;  %v316_v40 = vsel %vm314_vm3, %v313_v37, %v311_v38 }
  0xb3   : > { %v324_v41 = vmul.f32 %v320_v33, %v315_v39  ;;  %v325_v42 = vmul.f32 %v321_v34, %v316_v40 }
  0xb5   : > { %421 = vmatpush.msra.mxu0 %v324_v41  ;;  %441 = vmatpush.msra.mxu1 %v325_v42 }
  0xb7   : > { %422 = vmatpush.msra.mxu0 %v913_v0  ;;  %442 = vmatpush.msra.mxu1 %v918_v1 }
  0xb9   : > { %v273_v50 = vpop.permute.xlu1 %272  ;;  %v293_v51 = vpop.permute.xlu0 %292 }
  0xba   : > { %v295_v52 = vsel %vm294_vm4, %v291_v30, %v293_v51  ;;  %v296_v53 = vsel %vm294_vm4, %v293_v51, %v291_v30  ;;  %v277_v54 = vsel %vm276_vm5, %v273_v50, %v275_v47  ;;  %v278_v55 = vsel %vm276_vm5, %v275_v47, %v273_v50 }
  0xbb   : > { %v304_v56 = vmul.f32 %v300_v45, %v296_v53  ;;  %v305_v57 = vmul.f32 %v301_v46, %v295_v52  ;;  %v286_v58 = vmul.f32 %v282_v48, %v278_v55  ;;  %v287_v59 = vmul.f32 %v283_v49, %v277_v54 }
  0xbd   : > { %423 = vmatpush.msra.mxu0 %v304_v56  ;;  %443 = vmatpush.msra.mxu1 %v305_v57 }
  0xbf   : > { %424 = vmatpush.msra.mxu0 %v286_v58  ;;  %444 = vmatpush.msra.mxu1 %v287_v59 }
  0xc1   : > { %v257_v63 = vpop.permute.xlu1 %256  ;;  %v255_v0 = vpop.permute.xlu0 %254 }
  0xc2   : > { %v259_v1 = vsel %vm258_vm6, %v255_v0, %v257_v63  ;;  %v260_v2 = vsel %vm258_vm6, %v257_v63, %v255_v0 }
  0xc3   : > { %v268_v3 = vmul.f32 %v264_v61, %v260_v2  ;;  %v269_v4 = vmul.f32 %v265_v62, %v259_v1 }
  0xc5   : > { %425 = vmatpush.msra.mxu0 %v268_v3  ;;  %445 = vmatpush.msra.mxu1 %v269_v4 }
  0xc9   : > { %v238_v10 = vpop.permute.xlu0 %237  ;;  %v405_v6 = vpop.permute.xlu1 %404 }
  0xca   : > { %v242_v11 = vsel %vm241_vm7, %v236_v7, %v238_v10  ;;  %v243_v12 = vsel %vm241_vm7, %v238_v10, %v236_v7 }
  0xcb   : > { %v250_v13 = vmul.f32 %v246_v8, %v243_v12  ;;  %v251_v14 = vmul.f32 %v247_v9, %v242_v11 }
  0xcd   : > { %426 = vmatpush.msra.mxu0 %v250_v13  ;;  %446 = vmatpush.msra.mxu1 %v251_v14 }
  0xce   : > { %561 = vmatmul.msk.f32.vlgmr.msra.gmra.mxu0 %vm407_vm8, %v382_v15  ;;  %562 = vmatmul.msk.f32.vlgmr.msra.gmra.mxu1 %vm407_vm8, %v382_v15 }
 0x14b   : > { %v428_v16 = vpop.f32.mrf.mxu0  ;;  %v448_v17 = vpop.f32.mrf.mxu1 }
 0x14c   : > { %v429_v18 = vadd.f32 %v428_v16, %v405_v6  ;;  %v449_v19 = vadd.f32 %v448_v17, %v405_v6 }
 0x14e   : > { %451 = vst [vmem:[%s232_s20] sm:$0xff] %v429_v18 }
 0x14f   : > { %452 = vst [vmem:[%s232_s20 + $0x8] sm:$0xff] %v449_v19 }
 0x150   : > { %727 = shalt.err (!%p724_p8)
}
 0x151   : > { %576 = dma.vmem_to_hbm [thread:$0]  (%p868_p12), %s468_s24, 256, %s470_s7, %s454_s25  }
 0x152 PF: > { %p593_p9 = scmp.ge.s32.totalorder %s770_s18, 2  ;;  %s481_s9 = sand.u32 1, %s758_s15  }
 0x153   : > { %s482_s11 = scalar_lea.sflag [#allocation5], %s481_s9 }
 0x154   : > { %p587_p10 = pnand %p593_p9, %p873_p2 }
 0x156   : > { %p588_p13 = pneg %p587_p10 }
 0x158   : > { %753 = dma.done.wait (%p588_p13), %s482_s11, 256  }
 0x159   : > { %755 = vsyncadd (%p588_p13), %s482_s11, 4294967040  ;;  %p18_p0 = scmp.ge.s32.totalorder %s848_s29, 5   ;;  %s999_s15 = smov %s762_s16 }
 0x15a   : > { %s1000_s16 = smov %s766_s17  ;;  %s1001_s17 = smov %s860_s6 }
 0x15b   : > { %s1002_s18 = smov %s848_s29  ;;  %20 = sbr.rel (!%p18_p0) target bundleno = 6 (0x6), region = 92 }
 0x160   :  { %488 = vsyncpa [#allocation4], 1 }
 0x161   :  { %490 = vsyncpa [#allocation4 + $0x1], 1 }
 0x162   :  { %491 = vsyncpa [#allocation7], 1 }
 0x163   :  { %492 = vsyncpa [#allocation5], 1 }
 0x164   :  { %494 = vsyncpa [#allocation5 + $0x1], 1 }

</bundles_post_ra>
